<compile_context>
chip_gen: v7x
topology: tpu7x:2x2x1
jax: 0.10.0
libtpu: 0.0.40
codegen_flags: <defaults>
</compile_context>

<pallas_src>
import functools

import jax
import jax.numpy as jnp
from jax.experimental import pallas as pl
from jax.experimental.pallas import tpu as pltpu

IN_FEATURES = 10
OUT_FEATURES = 2


def linear_kernel(wt_ref, b_ref, xt_ref, yt_ref):
    """One batch tile of y^T = W @ x^T + b, computed on the VPU (no MXU).

    wt_ref: [IN, OUT]  pre-transposed weight (same block every grid step)
    b_ref : [OUT, 1]   bias
    xt_ref: [IN, TB]   batch tile, batch on the lane axis (lane-dense)
    yt_ref: [OUT, TB]  output tile, also lane-dense
    """
    xt = xt_ref[...]                      # [IN, TB] f32
    wt = wt_ref[...]                      # [IN, OUT] f32
    rows = []
    for o in range(OUT_FEATURES):         # OUT == 2 -> fully unrolled in Python
        wo = wt[:, o:o + 1]               # [IN, 1], lane-broadcast against xt
        # elementwise FMA chain + sublane reduction: [IN, TB] -> [1, TB]
        rows.append(jnp.sum(wo * xt, axis=0, keepdims=True))
    yt = jnp.concatenate(rows, axis=0) + b_ref[...]   # [OUT, TB] + [OUT, 1]
    yt_ref[...] = yt.astype(yt_ref.dtype)


@functools.partial(jax.jit, static_argnames=("tb",))
def linear_forward(x, weight, bias, *, tb=512):
    """x: [B, IN]; weight: [OUT, IN]; bias: [OUT] -> [B, OUT] (nn.Linear)."""
    B = x.shape[0]
    # Lane-dense batch tile: multiple of 128 lanes, never wider than needed.
    tb = min(tb, pl.cdiv(B, 128) * 128)
    b_pad = pl.cdiv(B, tb) * tb
    grid = (b_pad // tb,)

    # Transpose / pad the problem once in the wrapper (layout plumbing only).
    xt = jnp.pad(x.T, ((0, 0), (0, b_pad - B)))       # [IN, B_pad]
    wt = weight.T                                     # [IN, OUT] (no in-kernel .T)
    b2 = bias.reshape(OUT_FEATURES, 1)                # [OUT, 1]

    flops = 2 * B * IN_FEATURES * OUT_FEATURES
    bytes_accessed = 4 * (xt.size + wt.size + b2.size + OUT_FEATURES * b_pad)

    yt = pl.pallas_call(
        linear_kernel,
        out_shape=jax.ShapeDtypeStruct((OUT_FEATURES, b_pad), x.dtype),
        grid_spec=pltpu.PrefetchScalarGridSpec(
            num_scalar_prefetch=0,
            grid=grid,
            in_specs=[
                # weight / bias: same (whole-array) block every step -> resident
                pl.BlockSpec((IN_FEATURES, OUT_FEATURES), lambda i: (0, 0)),
                pl.BlockSpec((OUT_FEATURES, 1), lambda i: (0, 0)),
                # x^T streamed over the batch (lane) axis, double-buffered
                pl.BlockSpec((IN_FEATURES, tb), lambda i: (0, i)),
            ],
            out_specs=pl.BlockSpec((OUT_FEATURES, tb), lambda i: (0, i)),
        ),
        compiler_params=pltpu.CompilerParams(
            dimension_semantics=("parallel",),   # shard batch tiles across v7x TCs
        ),
        cost_estimate=pl.CostEstimate(
            flops=flops, transcendentals=0, bytes_accessed=bytes_accessed),
    )(wt, b2, xt)

    return yt[:, :B].T                                # back to [B, OUT]


if __name__ == "__main__":
    key = jax.random.PRNGKey(0)
    kx, kw, kb = jax.random.split(key, 3)

    # Small batch consistent with the module's [B, 10] input.
    B = 4
    x = jax.random.normal(kx, (B, IN_FEATURES), dtype=jnp.float32)

    # Deterministic params mimicking torch.nn.Linear's U(-1/sqrt(fan_in), ...) init.
    bound = 1.0 / jnp.sqrt(jnp.float32(IN_FEATURES))
    weight = jax.random.uniform(
        kw, (OUT_FEATURES, IN_FEATURES), minval=-bound, maxval=bound,
        dtype=jnp.float32)
    bias = jax.random.uniform(
        kb, (OUT_FEATURES,), minval=-bound, maxval=bound, dtype=jnp.float32)

    y = linear_forward(x, weight, bias)
    jax.block_until_ready(y)
    y_ref = x @ weight.T + bias
    assert y.shape == (B, OUT_FEATURES)
    assert jnp.allclose(y, y_ref, atol=1e-5, rtol=1e-5), (y, y_ref)

    # Also exercise the multi-tile grid + padding path (non-multiple of 128).
    B2 = 600
    x2 = jax.random.normal(kx, (B2, IN_FEATURES), dtype=jnp.float32)
    y2 = linear_forward(x2, weight, bias)
    jax.block_until_ready(y2)
    y2_ref = x2 @ weight.T + bias
    assert jnp.allclose(y2, y2_ref, atol=1e-5, rtol=1e-5)

    print("KERNEL_OK")
</pallas_src>

<mosaic_0001>
module attributes {stable_mosaic.version = 11 : i64} {
  func.func @linear_kernel(%arg0: i32, %arg1: memref<10x2xf32, #tpu.memory_space<vmem>>, %arg2: memref<2x1xf32, #tpu.memory_space<vmem>>, %arg3: memref<10x128xf32, #tpu.memory_space<vmem>>, %arg4: memref<2x128xf32, #tpu.memory_space<vmem>>) attributes {dimension_semantics = [#tpu.dimension_semantics<parallel>], iteration_bounds = array<i64: 1>, scalar_prefetch = 0 : i64, scratch_operands = 0 : i64, tpu.core_type = #tpu.core_type<tc>, window_params = [{pipeline_mode = #tpu.pipeline_mode<synchronous>, transform_indices = @transform_0, window_bounds = array<i64: 10, 2>}, {pipeline_mode = #tpu.pipeline_mode<synchronous>, transform_indices = @transform_1, window_bounds = array<i64: 2, 1>}, {transform_indices = @transform_2, window_bounds = array<i64: 10, 128>}, {transform_indices = @transform_3, window_bounds = array<i64: 2, 128>}]} {
    %c0 = arith.constant 0 : index
    %c0_0 = arith.constant 0 : index
    %0 = vector.load %arg3[%c0, %c0_0] : memref<10x128xf32, #tpu.memory_space<vmem>>, vector<10x128xf32>
    %c0_1 = arith.constant 0 : index
    %c0_2 = arith.constant 0 : index
    %1 = vector.load %arg1[%c0_1, %c0_2] : memref<10x2xf32, #tpu.memory_space<vmem>>, vector<10x2xf32>
    %2 = vector.extract_strided_slice %1 {offsets = [0, 0], sizes = [10, 1], strides = [1, 1]} : vector<10x2xf32> to vector<10x1xf32>
    %3 = vector.broadcast %2 : vector<10x1xf32> to vector<10x128xf32>
    %4 = arith.mulf %3, %0 : vector<10x128xf32>
    %cst = arith.constant dense<0.000000e+00> : vector<128xf32>
    %5 = vector.multi_reduction <add>, %4, %cst [0] : vector<10x128xf32> to vector<128xf32>
    %6 = vector.shape_cast %5 : vector<128xf32> to vector<1x128xf32>
    %7 = vector.extract_strided_slice %1 {offsets = [0, 1], sizes = [10, 1], strides = [1, 1]} : vector<10x2xf32> to vector<10x1xf32>
    %8 = vector.broadcast %7 : vector<10x1xf32> to vector<10x128xf32>
    %9 = arith.mulf %8, %0 : vector<10x128xf32>
    %cst_3 = arith.constant dense<0.000000e+00> : vector<128xf32>
    %10 = vector.multi_reduction <add>, %9, %cst_3 [0] : vector<10x128xf32> to vector<128xf32>
    %11 = vector.shape_cast %10 : vector<128xf32> to vector<1x128xf32>
    %12 = tpu.concatenate %6, %11 in 0 : vector<1x128xf32>, vector<1x128xf32> -> vector<2x128xf32>
    %c0_4 = arith.constant 0 : index
    %c0_5 = arith.constant 0 : index
    %13 = vector.load %arg2[%c0_4, %c0_5] : memref<2x1xf32, #tpu.memory_space<vmem>>, vector<2x1xf32>
    %14 = vector.broadcast %13 : vector<2x1xf32> to vector<2x128xf32>
    %15 = arith.addf %12, %14 : vector<2x128xf32>
    %c0_6 = arith.constant 0 : index
    %c0_7 = arith.constant 0 : index
    %16 = vector.load %arg4[%c0_6, %c0_7] : memref<2x128xf32, #tpu.memory_space<vmem>>, vector<2x128xf32>
    tpu.vector_store %arg4[%c0_6, %c0_7], %15 {strides = array<i32>} : memref<2x128xf32, #tpu.memory_space<vmem>>, vector<2x128xf32>,
    return
  }
  func.func @transform_0(%arg0: i32) -> (i32, i32) {
    %c0_i32 = arith.constant 0 : i32
    %c0_i32_0 = arith.constant 0 : i32
    %c0_i32_1 = arith.constant 0 : i32
    return %c0_i32, %c0_i32_0 : i32, i32
  }
  func.func @transform_1(%arg0: i32) -> (i32, i32) {
    %c0_i32 = arith.constant 0 : i32
    %c0_i32_0 = arith.constant 0 : i32
    %c0_i32_1 = arith.constant 0 : i32
    return %c0_i32, %c0_i32_0 : i32, i32
  }
  func.func @transform_2(%arg0: i32) -> (i32, i32) {
    %c0_i32 = arith.constant 0 : i32
    %c0_i32_0 = arith.constant 0 : i32
    return %c0_i32, %arg0 : i32, i32
  }
  func.func @transform_3(%arg0: i32) -> (i32, i32) {
    %c0_i32 = arith.constant 0 : i32
    %c0_i32_0 = arith.constant 0 : i32
    return %c0_i32, %arg0 : i32, i32
  }
}

</mosaic_0001>

<bundles_post_ra>
// kernel: linear_forward.1
= control target key start
LH: loop header
LB: loop body
LE: loop exit
PB: predicated region body
PF: predicated region fallthrough
CT: control target
= control target key end

     0   :  { %v79_v0 = vmov 0   ;;  %v80_v3 = vmov 1   ;;  %vm30_vm0 = vcmask 1041408   ;;  %vm57_vm1 = vcmask 1040384   ;;  %s119_s0 = inlined_call_operand.vmem [shape: f32[10,2], index: 0, kind: input, shape index: {}]   ;;  %s120_s1 = inlined_call_operand.vmem [shape: f32[2,1], index: 1, kind: input, shape index: {}]   ;;  %s121_s2 = inlined_call_operand.vmem [shape: f32[10,128], index: 2, kind: input, shape index: {}]   ;;  %s122_s3 = inlined_call_operand.vmem [shape: f32[2,128], index: 3, kind: output, shape index: {}]  }
   0x1   :  { %73 = vset.pattern.permute.xlu0 %v79_v0  ;;  %75 = vset.pattern.permute.xlu1 %v79_v0  ;;  %v17_v1 = vld [vmem:[%s119_s0 + $0x8] sm:$0x3]  ;;  %v16_v2 = vld [vmem:[%s119_s0] sm:$0xff] }
   0x2   :  { %25 = vperm.xlu0 %73, %v17_v1   ;;  %20 = vperm.xlu1 %75, %v16_v2   ;;  %v59_v4 = vld [vmem:[%s120_s1] sm:$0x3]  ;;  %v15_v5 = vld [vmem:[%s121_s2 + $0x8] sm:$0x3] }
   0x3   :  { %v14_v6 = vld [vmem:[%s121_s2] sm:$0xff] }
   0x6   :  { %74 = vset.pattern.permute.xlu0 %v80_v3  ;;  %76 = vset.pattern.permute.xlu1 %v80_v3 }
   0x7   :  { %44 = vperm.xlu0 %74, %v17_v1   ;;  %40 = vperm.xlu1 %76, %v16_v2  }
   0xb   :  { %77 = vset.pattern.permute.xlu1 %v79_v0  ;;  %78 = vset.pattern.permute.xlu0 %v79_v0 }
   0xc   :  { %62 = vperm.xlu1 %77, %v59_v4  }
  0x81   :  { %v26_v7 = vpop.permute.xlu0 %25  ;;  %v21_v8 = vpop.permute.xlu1 %20 }
  0x82   :  { %v29_v9 = vmul.f32 %v26_v7, %v15_v5  ;;  %v28_v10 = vmul.f32 %v21_v8, %v14_v6 }
  0x84   :  { %v31_v11 = vsel %vm30_vm0, %v29_v9, 0.0 }
  0x85   :  { %v32_v12 = vadd.f32 %v31_v11, %v28_v10 }
  0x86   :  { %v45_v13 = vpop.permute.xlu0 %44  ;;  %v41_v14 = vpop.permute.xlu1 %40 }
  0x87   :  { %v33_v15 = vrot.slane %v32_v12, 4  ;;  %v48_v16 = vmul.f32 %v45_v13, %v15_v5  ;;  %v47_v17 = vmul.f32 %v41_v14, %v14_v6 }
  0x89   :  { %v34_v18 = vadd.f32 %v33_v15, %v32_v12  ;;  %v49_v19 = vsel %vm30_vm0, %v48_v16, 0.0 }
  0x8a   :  { %v50_v20 = vadd.f32 %v49_v19, %v47_v17 }
  0x8b   :  { %v35_v21 = vrot.slane %v34_v18, 2  ;;  %v63_v31 = vpop.permute.xlu1 %62 }
  0x8c   :  { %v51_v22 = vrot.slane %v50_v20, 4 }
  0x8d   :  { %v36_v23 = vadd.f32 %v35_v21, %v34_v18 }
  0x8e   :  { %v52_v24 = vadd.f32 %v51_v22, %v50_v20 }
  0x8f   :  { %v37_v27 = vrot.slane %v36_v23, 1 }
  0x90   :  { %v53_v25 = vrot.slane %v52_v24, 2 }
  0x91   :  { %v38_v29 = vadd.f32 %v37_v27, %v36_v23 }
  0x92   :  { %v54_v26 = vadd.f32 %v53_v25, %v52_v24 }
  0x94   :  { %v55_v28 = vrot.slane %v54_v26, 1 }
  0x96   :  { %v56_v30 = vadd.f32 %v55_v28, %v54_v26 }
  0x98   :  { %v58_v32 = vsel %vm57_vm1, %v38_v29, %v56_v30 }
  0x99   :  { %v65_v33 = vadd.f32 %v63_v31, %v58_v32 }
  0x9b   :  { %66 = vst [vmem:[%s122_s3] sm:$0x3] %v65_v33 }

</bundles_post_ra>
